<compile_context>
chip_gen: v7x
topology: tpu7x:2x2x1
jax: 0.10.0
libtpu: 0.0.40
codegen_flags: <defaults>
</compile_context>

<pallas_src>
import jax
import jax.numpy as jnp
from jax.experimental import pallas as pl
from jax.experimental.pallas import tpu as pltpu

NEG_SLOPE = 0.01   # nn.LeakyReLU default
EPS = 1e-5         # nn.BatchNorm1d default


def _leaky_relu(x):
    return jnp.where(x > 0, x, NEG_SLOPE * x)


def _round_up(v, m):
    return ((v + m - 1) // m) * m


def _make_kernel(l_true):
    """l_true: un-padded length; columns >= l_true are padding (discarded later)."""

    def kernel(bn_ref, w1_ref, w2_ref, x_ref, o_ref):
        x = x_ref[0]                                   # (Cp, Lp) f32
        cp, lp = x.shape

        # (1, Lp) boundary masks, computed once and shared by both convs.
        # They kill (a) the roll wrap-around and (b) any leakage from padded
        # columns l >= l_true into valid output columns.
        col = jax.lax.broadcasted_iota(jnp.int32, (1, lp), 1)
        not_first = (col != 0).astype(x.dtype)               # gates h[:, l-1] at l == 0
        not_last = (col != (l_true - 1)).astype(x.dtype)     # gates h[:, l+1] at l == l_true-1

        def conv3(h, w_ref):
            # Shifted copies via XLU rolls (non-negative shifts only), edge-masked.
            h_m1 = pltpu.roll(h, shift=1, axis=1) * not_first       # h[:, l-1]
            h_p1 = pltpu.roll(h, shift=lp - 1, axis=1) * not_last   # h[:, l+1]
            # Three accumulating MXU dots, bf16 operands, f32 accumulation.
            acc = jnp.dot(w_ref[0], h_m1.astype(jnp.bfloat16),
                          preferred_element_type=jnp.float32)
            acc += jnp.dot(w_ref[1], h.astype(jnp.bfloat16),
                           preferred_element_type=jnp.float32)
            acc += jnp.dot(w_ref[2], h_p1.astype(jnp.bfloat16),
                           preferred_element_type=jnp.float32)
            return acc

        # BN1 (folded) + LeakyReLU  (f32 elementwise)
        h = _leaky_relu(x * bn_ref[0] + bn_ref[1])
        # Conv1d #1
        h = conv3(h, w1_ref)
        # BN2 (folded) + LeakyReLU
        h = _leaky_relu(h * bn_ref[2] + bn_ref[3])
        # Conv1d #2
        h = conv3(h, w2_ref)
        # Residual
        o_ref[0] = (x + h).astype(o_ref.dtype)

    return kernel


def fold_params(params):
    """Fold PyTorch-shaped parameters once (call this once per param set)."""
    C = params["gamma1"].shape[0]
    Cp = _round_up(C, 8)
    dc = Cp - C

    def fold_bn(gamma, beta, mean, var):
        # Padded channels get scale=0, shift=0 so they stay exactly zero.
        gamma = jnp.pad(gamma, (0, dc))
        beta = jnp.pad(beta, (0, dc))
        mean = jnp.pad(mean, (0, dc))
        var = jnp.pad(var, (0, dc), constant_values=1.0)
        scale = gamma / jnp.sqrt(var + EPS)
        shift = beta - mean * scale
        return scale, shift

    s1, t1 = fold_bn(params["gamma1"], params["beta1"], params["mean1"], params["var1"])
    s2, t2 = fold_bn(params["gamma2"], params["beta2"], params["mean2"], params["var2"])
    bn = jnp.stack([s1, t1, s2, t2], axis=0).reshape(4, Cp, 1).astype(jnp.float32)

    def fold_w(w):
        # PyTorch Conv1d weight (C_out, C_in, 3) -> (3, Cp_out, Cp_in) bf16,
        # tap k multiplies h[:, l + k - 1].
        w = jnp.pad(w, ((0, dc), (0, dc), (0, 0)))
        return jnp.transpose(w, (2, 0, 1)).astype(jnp.bfloat16)

    return {"bn": bn, "w1": fold_w(params["w1"]), "w2": fold_w(params["w2"]), "C": C}


def conv1d_block(x, folded):
    """x: (N, C, L) float32. folded: output of fold_params()."""
    N, C, L = x.shape
    Cp = folded["bn"].shape[1]
    Lp = _round_up(L, 128)
    dc, dl = Cp - C, Lp - L

    x_p = x if (dc == 0 and dl == 0) else jnp.pad(x, ((0, 0), (0, dc), (0, dl)))

    # VMEM budget: x in + out double-buffered, live intermediates, weights, BN,
    # plus ~25% headroom for compiler temporaries.  Never below the 32 MiB default.
    block_bytes = Cp * Lp * 4
    est = (4 * block_bytes          # x in + out, double-buffered
           + 6 * block_bytes        # h, rolled copies, bf16 casts, accumulator
           + 2 * 3 * Cp * Cp * 2    # bf16 weights
           + 4 * Cp * 4 + 4 * Lp)   # BN params + masks
    vmem_limit = min(max(int(1.25 * est), 32 * 1024 * 1024), 100 * 1024 * 1024)

    flops = 2 * (2 * Cp * (3 * Cp) * Lp) * N           # two k=3 convs as matmuls
    bytes_accessed = 2 * N * Cp * Lp * 4 + 2 * 3 * Cp * Cp * 2 + 4 * Cp * 4

    const3d = lambda b: (0, 0, 0)
    out_p = pl.pallas_call(
        _make_kernel(L),
        out_shape=jax.ShapeDtypeStruct((N, Cp, Lp), x.dtype),
        grid=(N,),
        in_specs=[
            pl.BlockSpec((4, Cp, 1), const3d),             # fused BN scale/shift
            pl.BlockSpec((3, Cp, Cp), const3d),            # w1 taps (bf16)
            pl.BlockSpec((3, Cp, Cp), const3d),            # w2 taps (bf16)
            pl.BlockSpec((1, Cp, Lp), lambda b: (b, 0, 0)),  # x
        ],
        out_specs=pl.BlockSpec((1, Cp, Lp), lambda b: (b, 0, 0)),
        compiler_params=pltpu.CompilerParams(
            dimension_semantics=("parallel",),
            vmem_limit_bytes=vmem_limit,
        ),
        cost_estimate=pl.CostEstimate(
            flops=flops, transcendentals=0, bytes_accessed=bytes_accessed),
    )(folded["bn"], folded["w1"], folded["w2"], x_p)

    if dc == 0 and dl == 0:
        return out_p
    return out_p[:, :C, :L]


def conv1d_block_reference(x, params):
    """Pure-JAX reference (eval-mode BN).  Conv operands are cast to bf16 with
    f32 accumulation to match the kernel's MXU path."""
    def bn(h, g, b, m, v):
        g, b, m, v = (a[None, :, None] for a in (g, b, m, v))
        return (h - m) / jnp.sqrt(v + EPS) * g + b

    def conv(h, w):
        return jax.lax.conv_general_dilated(
            h.astype(jnp.bfloat16), w.astype(jnp.bfloat16),
            window_strides=(1,), padding=((1, 1),),
            dimension_numbers=("NCH", "OIH", "NCH"),
            preferred_element_type=jnp.float32)

    h = _leaky_relu(bn(x, params["gamma1"], params["beta1"], params["mean1"], params["var1"]))
    h = conv(h, params["w1"])
    h = _leaky_relu(bn(h, params["gamma2"], params["beta2"], params["mean2"], params["var2"]))
    h = conv(h, params["w2"])
    return x + h


if __name__ == "__main__":
    N, C, L = 2, 4, 16
    key = jax.random.PRNGKey(0)
    keys = jax.random.split(key, 11)

    params = {
        "gamma1": 1.0 + 0.1 * jax.random.normal(keys[0], (C,), jnp.float32),
        "beta1": 0.1 * jax.random.normal(keys[1], (C,), jnp.float32),
        "mean1": 0.1 * jax.random.normal(keys[2], (C,), jnp.float32),
        "var1": jax.random.uniform(keys[3], (C,), jnp.float32, 0.5, 1.5),
        "w1": 0.3 * jax.random.normal(keys[4], (C, C, 3), jnp.float32),
        "gamma2": 1.0 + 0.1 * jax.random.normal(keys[5], (C,), jnp.float32),
        "beta2": 0.1 * jax.random.normal(keys[6], (C,), jnp.float32),
        "mean2": 0.1 * jax.random.normal(keys[7], (C,), jnp.float32),
        "var2": jax.random.uniform(keys[8], (C,), jnp.float32, 0.5, 1.5),
        "w2": 0.3 * jax.random.normal(keys[9], (C, C, 3), jnp.float32),
    }
    x = jax.random.normal(keys[10], (N, C, L), jnp.float32)

    folded = fold_params(params)   # folded once, reused across calls
    out = jax.block_until_ready(conv1d_block(x, folded))
    ref = jax.block_until_ready(conv1d_block_reference(x, params))

    assert out.shape == (N, C, L) and out.dtype == jnp.float32
    # bf16 dot operands (f32 accumulate) in both kernel and reference; loose-ish
    # tolerance absorbs formulation-order rounding differences at the bf16 casts.
    assert jnp.allclose(out, ref, atol=1e-2, rtol=1e-2), float(jnp.max(jnp.abs(out - ref)))
    print("KERNEL_OK")
</pallas_src>

<mosaic_0001>
module attributes {stable_mosaic.version = 11 : i64} {
  func.func @kernel(%arg0: i32, %arg1: memref<4x8x1xf32, #tpu.memory_space<vmem>>, %arg2: memref<3x8x8xbf16, #tpu.memory_space<vmem>>, %arg3: memref<3x8x8xbf16, #tpu.memory_space<vmem>>, %arg4: memref<1x8x128xf32, #tpu.memory_space<vmem>>, %arg5: memref<1x8x128xf32, #tpu.memory_space<vmem>>) attributes {dimension_semantics = [#tpu.dimension_semantics<parallel>], iteration_bounds = array<i64: 2>, scalar_prefetch = 0 : i64, scratch_operands = 0 : i64, tpu.core_type = #tpu.core_type<tc>, window_params = [{pipeline_mode = #tpu.pipeline_mode<synchronous>, transform_indices = @transform_0, window_bounds = array<i64: 4, 8, 1>}, {pipeline_mode = #tpu.pipeline_mode<synchronous>, transform_indices = @transform_1, window_bounds = array<i64: 3, 8, 8>}, {pipeline_mode = #tpu.pipeline_mode<synchronous>, transform_indices = @transform_2, window_bounds = array<i64: 3, 8, 8>}, {transform_indices = @transform_3, window_bounds = array<i64: 1, 8, 128>}, {transform_indices = @transform_4, window_bounds = array<i64: 1, 8, 128>}]} {
    %c0 = arith.constant 0 : index
    %c0_0 = arith.constant 0 : index
    %c0_1 = arith.constant 0 : index
    %0 = vector.load %arg4[%c0, %c0_0, %c0_1] : memref<1x8x128xf32, #tpu.memory_space<vmem>>, vector<1x8x128xf32>
    %1 = vector.shape_cast %0 : vector<1x8x128xf32> to vector<8x128xf32>
    %2 = tpu.iota {dimensions = array<i32: 1>} : vector<1x128xi32>
    %c0_i32 = arith.constant 0 : i32
    %3 = vector.broadcast %c0_i32 : i32 to vector<1x128xi32>
    %4 = arith.cmpi ne, %2, %3 : vector<1x128xi32>
    %5 = arith.extui %4 : vector<1x128xi1> to vector<1x128xi32>
    %6 = arith.sitofp %5 : vector<1x128xi32> to vector<1x128xf32>
    %c15_i32 = arith.constant 15 : i32
    %7 = vector.broadcast %c15_i32 : i32 to vector<1x128xi32>
    %8 = arith.cmpi ne, %2, %7 : vector<1x128xi32>
    %9 = arith.extui %8 : vector<1x128xi1> to vector<1x128xi32>
    %10 = arith.sitofp %9 : vector<1x128xi32> to vector<1x128xf32>
    %c0_2 = arith.constant 0 : index
    %c0_3 = arith.constant 0 : index
    %c0_4 = arith.constant 0 : index
    %11 = vector.load %arg1[%c0_2, %c0_3, %c0_4] : memref<4x8x1xf32, #tpu.memory_space<vmem>>, vector<1x8x1xf32>
    %12 = vector.shape_cast %11 : vector<1x8x1xf32> to vector<8x1xf32>
    %13 = vector.broadcast %12 : vector<8x1xf32> to vector<8x128xf32>
    %14 = arith.mulf %1, %13 : vector<8x128xf32>
    %c1 = arith.constant 1 : index
    %c0_5 = arith.constant 0 : index
    %c0_6 = arith.constant 0 : index
    %15 = vector.load %arg1[%c1, %c0_5, %c0_6] : memref<4x8x1xf32, #tpu.memory_space<vmem>>, vector<1x8x1xf32>
    %16 = vector.shape_cast %15 : vector<1x8x1xf32> to vector<8x1xf32>
    %17 = vector.broadcast %16 : vector<8x1xf32> to vector<8x128xf32>
    %18 = arith.addf %14, %17 : vector<8x128xf32>
    %cst = arith.constant 0.000000e+00 : f32
    %19 = vector.broadcast %cst : f32 to vector<8x128xf32>
    %20 = arith.cmpf ogt, %18, %19 : vector<8x128xf32>
    %cst_7 = arith.constant 0.00999999977 : f32
    %21 = vector.broadcast %cst_7 : f32 to vector<8x128xf32>
    %22 = arith.mulf %21, %18 : vector<8x128xf32>
    %23 = arith.select %20, %18, %22 : vector<8x128xi1>, vector<8x128xf32>
    %c1_i32 = arith.constant 1 : i32
    %24 = tpu.dynamic_rotate %23 by %c1_i32 dim 1 : vector<8x128xf32>, i32 -> vector<8x128xf32>
    %25 = vector.broadcast %6 : vector<1x128xf32> to vector<8x128xf32>
    %26 = arith.mulf %24, %25 : vector<8x128xf32>
    %c127_i32 = arith.constant 127 : i32
    %27 = tpu.dynamic_rotate %23 by %c127_i32 dim 1 : vector<8x128xf32>, i32 -> vector<8x128xf32>
    %28 = vector.broadcast %10 : vector<1x128xf32> to vector<8x128xf32>
    %29 = arith.mulf %27, %28 : vector<8x128xf32>
    %c0_8 = arith.constant 0 : index
    %c0_9 = arith.constant 0 : index
    %c0_10 = arith.constant 0 : index
    %30 = vector.load %arg2[%c0_8, %c0_9, %c0_10] : memref<3x8x8xbf16, #tpu.memory_space<vmem>>, vector<1x8x8xbf16>
    %31 = vector.shape_cast %30 : vector<1x8x8xbf16> to vector<8x8xbf16>
    %32 = arith.truncf %26 : vector<8x128xf32> to vector<8x128xbf16>
    %cst_11 = arith.constant dense<0.000000e+00> : vector<8x128xf32>
    %33 = tpu.matmul %31, %32, %cst_11 {dimension_numbers = #tpu.dot_dimension_numbers<[1], [0], [0], [1], [0, 0, 1, 1], [], []>} : vector<8x8xbf16>, vector<8x128xbf16>, vector<8x128xf32> -> vector<8x128xf32>
    %c1_12 = arith.constant 1 : index
    %c0_13 = arith.constant 0 : index
    %c0_14 = arith.constant 0 : index
    %34 = vector.load %arg2[%c1_12, %c0_13, %c0_14] : memref<3x8x8xbf16, #tpu.memory_space<vmem>>, vector<1x8x8xbf16>
    %35 = vector.shape_cast %34 : vector<1x8x8xbf16> to vector<8x8xbf16>
    %36 = arith.truncf %23 : vector<8x128xf32> to vector<8x128xbf16>
    %cst_15 = arith.constant dense<0.000000e+00> : vector<8x128xf32>
    %37 = tpu.matmul %35, %36, %cst_15 {dimension_numbers = #tpu.dot_dimension_numbers<[1], [0], [0], [1], [0, 0, 1, 1], [], []>} : vector<8x8xbf16>, vector<8x128xbf16>, vector<8x128xf32> -> vector<8x128xf32>
    %38 = arith.addf %33, %37 : vector<8x128xf32>
    %c2 = arith.constant 2 : index
    %c0_16 = arith.constant 0 : index
    %c0_17 = arith.constant 0 : index
    %39 = vector.load %arg2[%c2, %c0_16, %c0_17] : memref<3x8x8xbf16, #tpu.memory_space<vmem>>, vector<1x8x8xbf16>
    %40 = vector.shape_cast %39 : vector<1x8x8xbf16> to vector<8x8xbf16>
    %41 = arith.truncf %29 : vector<8x128xf32> to vector<8x128xbf16>
    %cst_18 = arith.constant dense<0.000000e+00> : vector<8x128xf32>
    %42 = tpu.matmul %40, %41, %cst_18 {dimension_numbers = #tpu.dot_dimension_numbers<[1], [0], [0], [1], [0, 0, 1, 1], [], []>} : vector<8x8xbf16>, vector<8x128xbf16>, vector<8x128xf32> -> vector<8x128xf32>
    %43 = arith.addf %38, %42 : vector<8x128xf32>
    %c2_19 = arith.constant 2 : index
    %c0_20 = arith.constant 0 : index
    %c0_21 = arith.constant 0 : index
    %44 = vector.load %arg1[%c2_19, %c0_20, %c0_21] : memref<4x8x1xf32, #tpu.memory_space<vmem>>, vector<1x8x1xf32>
    %45 = vector.shape_cast %44 : vector<1x8x1xf32> to vector<8x1xf32>
    %46 = vector.broadcast %45 : vector<8x1xf32> to vector<8x128xf32>
    %47 = arith.mulf %43, %46 : vector<8x128xf32>
    %c3 = arith.constant 3 : index
    %c0_22 = arith.constant 0 : index
    %c0_23 = arith.constant 0 : index
    %48 = vector.load %arg1[%c3, %c0_22, %c0_23] : memref<4x8x1xf32, #tpu.memory_space<vmem>>, vector<1x8x1xf32>
    %49 = vector.shape_cast %48 : vector<1x8x1xf32> to vector<8x1xf32>
    %50 = vector.broadcast %49 : vector<8x1xf32> to vector<8x128xf32>
    %51 = arith.addf %47, %50 : vector<8x128xf32>
    %cst_24 = arith.constant 0.000000e+00 : f32
    %52 = vector.broadcast %cst_24 : f32 to vector<8x128xf32>
    %53 = arith.cmpf ogt, %51, %52 : vector<8x128xf32>
    %cst_25 = arith.constant 0.00999999977 : f32
    %54 = vector.broadcast %cst_25 : f32 to vector<8x128xf32>
    %55 = arith.mulf %54, %51 : vector<8x128xf32>
    %56 = arith.select %53, %51, %55 : vector<8x128xi1>, vector<8x128xf32>
    %c1_i32_26 = arith.constant 1 : i32
    %57 = tpu.dynamic_rotate %56 by %c1_i32_26 dim 1 : vector<8x128xf32>, i32 -> vector<8x128xf32>
    %58 = vector.broadcast %6 : vector<1x128xf32> to vector<8x128xf32>
    %59 = arith.mulf %57, %58 : vector<8x128xf32>
    %c127_i32_27 = arith.constant 127 : i32
    %60 = tpu.dynamic_rotate %56 by %c127_i32_27 dim 1 : vector<8x128xf32>, i32 -> vector<8x128xf32>
    %61 = vector.broadcast %10 : vector<1x128xf32> to vector<8x128xf32>
    %62 = arith.mulf %60, %61 : vector<8x128xf32>
    %c0_28 = arith.constant 0 : index
    %c0_29 = arith.constant 0 : index
    %c0_30 = arith.constant 0 : index
    %63 = vector.load %arg3[%c0_28, %c0_29, %c0_30] : memref<3x8x8xbf16, #tpu.memory_space<vmem>>, vector<1x8x8xbf16>
    %64 = vector.shape_cast %63 : vector<1x8x8xbf16> to vector<8x8xbf16>
    %65 = arith.truncf %59 : vector<8x128xf32> to vector<8x128xbf16>
    %cst_31 = arith.constant dense<0.000000e+00> : vector<8x128xf32>
    %66 = tpu.matmul %64, %65, %cst_31 {dimension_numbers = #tpu.dot_dimension_numbers<[1], [0], [0], [1], [0, 0, 1, 1], [], []>} : vector<8x8xbf16>, vector<8x128xbf16>, vector<8x128xf32> -> vector<8x128xf32>
    %c1_32 = arith.constant 1 : index
    %c0_33 = arith.constant 0 : index
    %c0_34 = arith.constant 0 : index
    %67 = vector.load %arg3[%c1_32, %c0_33, %c0_34] : memref<3x8x8xbf16, #tpu.memory_space<vmem>>, vector<1x8x8xbf16>
    %68 = vector.shape_cast %67 : vector<1x8x8xbf16> to vector<8x8xbf16>
    %69 = arith.truncf %56 : vector<8x128xf32> to vector<8x128xbf16>
    %cst_35 = arith.constant dense<0.000000e+00> : vector<8x128xf32>
    %70 = tpu.matmul %68, %69, %cst_35 {dimension_numbers = #tpu.dot_dimension_numbers<[1], [0], [0], [1], [0, 0, 1, 1], [], []>} : vector<8x8xbf16>, vector<8x128xbf16>, vector<8x128xf32> -> vector<8x128xf32>
    %71 = arith.addf %66, %70 : vector<8x128xf32>
    %c2_36 = arith.constant 2 : index
    %c0_37 = arith.constant 0 : index
    %c0_38 = arith.constant 0 : index
    %72 = vector.load %arg3[%c2_36, %c0_37, %c0_38] : memref<3x8x8xbf16, #tpu.memory_space<vmem>>, vector<1x8x8xbf16>
    %73 = vector.shape_cast %72 : vector<1x8x8xbf16> to vector<8x8xbf16>
    %74 = arith.truncf %62 : vector<8x128xf32> to vector<8x128xbf16>
    %cst_39 = arith.constant dense<0.000000e+00> : vector<8x128xf32>
    %75 = tpu.matmul %73, %74, %cst_39 {dimension_numbers = #tpu.dot_dimension_numbers<[1], [0], [0], [1], [0, 0, 1, 1], [], []>} : vector<8x8xbf16>, vector<8x128xbf16>, vector<8x128xf32> -> vector<8x128xf32>
    %76 = arith.addf %71, %75 : vector<8x128xf32>
    %77 = arith.addf %1, %76 : vector<8x128xf32>
    %c0_40 = arith.constant 0 : index
    %c0_41 = arith.constant 0 : index
    %c0_42 = arith.constant 0 : index
    %78 = vector.load %arg5[%c0_40, %c0_41, %c0_42] : memref<1x8x128xf32, #tpu.memory_space<vmem>>, vector<1x8x128xf32>
    %79 = vector.shape_cast %78 : vector<1x8x128xf32> to vector<8x128xf32>
    %80 = vector.shape_cast %77 : vector<8x128xf32> to vector<1x8x128xf32>
    tpu.vector_store %arg5[%c0_40, %c0_41, %c0_42], %80 {strides = array<i32>} : memref<1x8x128xf32, #tpu.memory_space<vmem>>, vector<1x8x128xf32>,
    return
  }
  func.func @transform_0(%arg0: i32) -> (i32, i32, i32) {
    %c0_i32 = arith.constant 0 : i32
    %c0_i32_0 = arith.constant 0 : i32
    %c0_i32_1 = arith.constant 0 : i32
    %c0_i32_2 = arith.constant 0 : i32
    return %c0_i32, %c0_i32_0, %c0_i32_1 : i32, i32, i32
  }
  func.func @transform_1(%arg0: i32) -> (i32, i32, i32) {
    %c0_i32 = arith.constant 0 : i32
    %c0_i32_0 = arith.constant 0 : i32
    %c0_i32_1 = arith.constant 0 : i32
    %c0_i32_2 = arith.constant 0 : i32
    return %c0_i32, %c0_i32_0, %c0_i32_1 : i32, i32, i32
  }
  func.func @transform_2(%arg0: i32) -> (i32, i32, i32) {
    %c0_i32 = arith.constant 0 : i32
    %c0_i32_0 = arith.constant 0 : i32
    %c0_i32_1 = arith.constant 0 : i32
    %c0_i32_2 = arith.constant 0 : i32
    return %c0_i32, %c0_i32_0, %c0_i32_1 : i32, i32, i32
  }
  func.func @transform_3(%arg0: i32) -> (i32, i32, i32) {
    %c0_i32 = arith.constant 0 : i32
    %c0_i32_0 = arith.constant 0 : i32
    %c0_i32_1 = arith.constant 0 : i32
    return %arg0, %c0_i32, %c0_i32_0 : i32, i32, i32
  }
  func.func @transform_4(%arg0: i32) -> (i32, i32, i32) {
    %c0_i32 = arith.constant 0 : i32
    %c0_i32_0 = arith.constant 0 : i32
    %c0_i32_1 = arith.constant 0 : i32
    return %arg0, %c0_i32, %c0_i32_0 : i32, i32, i32
  }
}

</mosaic_0001>

<bundles_post_ra>
// kernel: tpu_custom_call.1
= control target key start
LH: loop header
LB: loop body
LE: loop exit
PB: predicated region body
PF: predicated region fallthrough
CT: control target
= control target key end

     0   :  { %9 = vsyncpa [#allocation3], 0  ;;  %s1015_s0 = inlined_call_operand.vmem [shape: f32[4,8,1], index: 0, kind: input, shape index: {}]   ;;  %s1016_s1 = inlined_call_operand.vmem [shape: bf16[3,8,8], index: 1, kind: input, shape index: {}]   ;;  %s1017_s2 = inlined_call_operand.vmem [shape: bf16[3,8,8], index: 2, kind: input, shape index: {}]   ;;  %s1018_s3 = inlined_call_operand.vmem [shape: f32[2,8,128], index: 3, kind: input, shape index: {}]   ;;  %s1019_s4 = inlined_call_operand.hbm [shape: f32[2,8,128], index: 4, kind: output, shape index: {}]  }
   0x1   :  { %11 = vsyncpa [#allocation3 + $0x1], 0  ;;  %s845_s15 = smov 0   ;;  %s847_s16 = smov 0  }
   0x2   :  { %s849_s17 = smov 0   ;;  %s851_s18 = smov 0  }
   0x3 LB: > { %s866_s19 = sadd.s32 4294967295, %s812_s18   ;;  %s623_s20 = sadd.s32 4294967294, %s812_s18   ;;  %s812_s18 = sphi %s851_s18, %s1025_s18   ;;  %s808_s17 = sphi %s849_s17, %s1024_s17   ;;  %s804_s16 = sphi %s847_s16, %s1023_s16   ;;  %s800_s15 = sphi %s845_s15, %s1022_s15  }
   0x4   : > { %s870_s21 = sadd.s32 1, %s812_s18   ;;  %s113_s22 = sadd.s32 1, %s808_s17 }
   0x5   : > { %s110_s23 = ssub.s32 %s812_s18, %s870_s21  ;;  %p123_p0 = scmp.ne.s32.totalorder %s808_s17, %s804_s16 }
   0x6   : > { %p111_p1 = scmp.eq.s32.totalorder %s110_s23, 0  ;;  %p124_p2 = scmp.eq.s32.totalorder %s866_s19, 1 }
   0x7   : > { %p129_p3 = scmp.ne.s32.totalorder %s804_s16, %s800_s15  ;;  %p130_p4 = scmp.eq.s32.totalorder %s623_s20, 1 }
   0x8   : > { %s881_s24 = scalar_select %p111_p1, %s808_s17, %s113_s22  }
   0x9   : > { %p883_p5 = por %p124_p2, %p123_p0  ;;  %p887_p6 = por %p130_p4, %p129_p3 }
   0xa   : > { %p626_p7 = scmp.ge.s32.totalorder %s812_s18, 1  ;;  %p164_p8 = scmp.lt.s32.totalorder %s812_s18, 3 }
   0xc   : > { %p165_p9 = pnand %p626_p7, %p164_p8 }
   0xd   : > { %v203_v0 = vld [vmem:[%s1015_s0] sm:$0xff] (!%p165_p9)  ;;  %v814_v1 = vmov (!%p165_p9), 0   ;;  %v631_v2 = vld [vmem:[%s1015_s0 + $0x8] sm:$0xff] (!%p165_p9)  ;;  %v637_v3 = vld [vmem:[%s1015_s0 + $0x10] sm:$0xff] (!%p165_p9)  ;;  %v815_v4 = vmov (!%p165_p9), 0.0   ;;  %vm816_vm0 = vmmov (!%p165_p9), 0   ;;  %v195_v16 = vlaneseq (!%p165_p9) }
   0xe   : > { %168 = sbr.rel (%p165_p9) target bundleno = 867 (0x363), region = 36  ;;  %748 = vset.pattern.permute.xlu0 (!%p165_p9), %v814_v1  ;;  %749 = vset.pattern.permute.xlu1 (!%p165_p9), %v814_v1  ;;  %p189_p10 = scmp.lt.s32.totalorder (!%p165_p9), %s866_s19, 1  ;;  %vm236_vm2 = vcmask (!%p165_p9), 1043456   ;;  %v632_v14 = vld [vmem:[%s1016_s1 + $0x4] sm:$0xf] (!%p165_p9)  ;;  %vm232_vm3 = vcmask (!%p165_p9), 64512  }
   0xf   : > { %206 = vperm.xlu0 (!%p165_p9), %748, %v203_v0   ;;  %660 = vmatprep.subr.bf16.mxu0 (!%p165_p9), %v815_v4  ;;  %s817_s12 = smov (!%p165_p9), 1   ;;  %s818_s20 = smov (!%p165_p9), 127   ;;  %v638_v15 = vld [vmem:[%s1015_s0 + $0x18] sm:$0xff] (!%p165_p9)  ;;  %v196_v17 = vand.u32 (!%p165_p9), 127, %v195_v16  ;;  %v227_v26 = vld [vmem:[%s1016_s1] sm:$0xf] (!%p165_p9) }
  0x10   : > { %678 = vmatprep.subr.bf16.mxu1 (!%p165_p9), %v815_v4  ;;  %662 = vmatprep.mubr.msk.bf16.mxu0 (!%p165_p9), %vm816_vm0, %v815_v4  ;;  %v635_v29 = vld [vmem:[%s1016_s1 + $0x8] sm:$0xf] (!%p165_p9)  ;;  %v639_v42 = vld [vmem:[%s1017_s2 + $0x4] sm:$0xf] (!%p165_p9)  ;;  %v401_v50 = vld [vmem:[%s1017_s2] sm:$0xf] (!%p165_p9) }
  0x11   : > { %680 = vmatprep.mubr.msk.bf16.mxu1 (!%p165_p9), %vm816_vm0, %v815_v4  ;;  %vm197_vm4 = vcmp.ne.s32.totalorder (!%p165_p9), %v196_v17, 0  ;;  %vm200_vm5 = vcmp.ne.s32.totalorder (!%p165_p9), %v196_v17, 15  ;;  %v642_v52 = vld [vmem:[%s1017_s2 + $0x8] sm:$0xf] (!%p165_p9)  ;;  %s645_s13 = sshll.u32 (!%p165_p9), %s866_s19, 7  ;;  %s819_s29 = smov (!%p165_p9), [#allocation2]  }
  0x12   : > { %v629_v18 = vsel (!%p165_p9), %vm197_vm4, 1.0, %v815_v4  ;;  %v630_v21 = vsel (!%p165_p9), %vm200_vm5, 1.0, %v815_v4  ;;  %s973_s27 = scalar_lea.hbm (!%p165_p9), %s1019_s4, %s645_s13  ;;  %s754_s30 = sshll.u32 (!%p165_p9), %s819_s29, 4  ;;  %s755_s30 = int_to_ptr.vmem [resolvable:$false] %s754_s30 }
  0x13   : > { %214 = vperm.xlu0 (!%p165_p9), %748, %v631_v2   ;;  %s756_s5 = scalar_lea.vmem (!%p165_p9), %s755_s30, 256 }
  0x15   : > { %s190_s7 = scalar_select %p189_p10, %s866_s19, 1 }
  0x17   : > { %380 = vperm.xlu0 %748, %v637_v3   ;;  %s628_s8 = sshll.u32 %s190_s7, 3 }
  0x18   : > { %s192_s11 = scalar_lea.vmem %s1018_s3, %s628_s8 }
  0x19   : > { %v913_v6 = vld [vmem:[%s192_s11] sm:$0xff]  ;;  %s186_s11 = sand.u32 1, %s804_s16  }
  0x1a   : > { %s551_s19 = scalar_lea.sflag [#allocation3], %s186_s11 }
  0x8e   : > { %v207_v5 = vpop.permute.xlu0 %206 }
  0x8f   : > { %v209_v7 = vmul.f32 %v207_v5, %v913_v6 }
  0x92   : > { %v215_v8 = vpop.permute.xlu0 %214 }
  0x93   : > { %v217_v9 = vadd.f32 %v215_v8, %v209_v7 }
  0x95   : > { %v219_v10 = vmul.f32 0.01, %v217_v9  ;;  %vm218_vm1 = vcmp.gt.f32.partialorder %v217_v9, 0.0 }
  0x96   : > { %v381_v30 = vpop.permute.xlu0 %380 }
  0x97   : > { %v220_v11 = vsel %vm218_vm1, %v217_v9, %v219_v10 }
  0x98   : > { %221 = vrot.lane.b32.xlu1 %v220_v11, %s817_s12  ;;  %v231_v12 = vpack.c.bf16 %v220_v11, %v220_v11 }
  0x9a   : > { %v238_v13 = vsel %vm236_vm2, %v231_v12, 0 }
  0x9b   : > { %661 = vmatpush3.bf16.msra.mxu0 %v238_v13 }
  0x9c   : > { %224 = vrot.lane.b32.xlu1 %v220_v11, %s818_s20  ;;  %666 = vmatprep.subr.bf16.mxu0 %v815_v4 }
  0x9e   : > { %663 = vmatmul.mubr.msk.bf16.vlgmr.msra.gmra.mrb[0].mxu0 %vm232_vm3, %v632_v14 }
  0x9f   : > { %668 = vmatprep.mubr.msk.bf16.mxu0 %vm816_vm0, %v815_v4 }
  0xa0   : > { %388 = vperm.xlu1 %749, %v638_v15  }
 0x10a   : > { %v222_v19 = vpop.permute.xlu1 %221 }
 0x10b   : > { %v223_v20 = vmul.f32 %v629_v18, %v222_v19 }
 0x10d   : > { %v228_v22 = vpack.c.bf16 %v223_v20, %v223_v20 }
 0x10e   : > { %v225_v23 = vpop.permute.xlu1 %224 }
 0x10f   : > { %v284_v24 = vsel %vm236_vm2, %v228_v22, 0  ;;  %v226_v25 = vmul.f32 %v630_v21, %v225_v23 }
 0x110   : > { %667 = vmatpush3.bf16.msra.mxu0 %v284_v24 }
 0x111   : > { %v328_v27 = vpack.c.bf16 %v226_v25, %v226_v25  ;;  %672 = vmatprep.subr.bf16.mxu0 %v815_v4 }
 0x113   : > { %v333_v28 = vsel %vm236_vm2, %v328_v27, 0  ;;  %669 = vmatmul.mubr.msk.bf16.vlgmr.msra.gmra.mrb[0].mxu0 %vm232_vm3, %v227_v26 }
 0x114   : > { %673 = vmatpush3.bf16.msra.mxu0 %v333_v28  ;;  %674 = vmatprep.mubr.msk.bf16.mxu0 %vm816_vm0, %v815_v4 }
 0x11f   : > { %675 = vmatmul.mubr.msk.bf16.vlgmr.msra.gmra.mrb[0].mxu0 %vm232_vm3, %v635_v29  ;;  %v389_v32 = vpop.permute.xlu1 %388 }
 0x1f2   : > { %v369_v31 = vpop.f32.mrb[0].mxu0 }
 0x1f3   : > { %v383_v33 = vmul.f32 %v381_v30, %v369_v31  ;;  %v676_v34 = vpop.f32.mrb[1].mxu0 }
 0x1f4   : > { %v372_v35 = vpop.f32.mrb[2].mxu0 }
 0x1f5   : > { %v391_v36 = vadd.f32 %v389_v32, %v383_v33  ;;  %v677_v37 = vpop.f32.mrb[3].mxu0 }
 0x1f7   : > { %v393_v38 = vmul.f32 0.01, %v391_v36  ;;  %vm392_vm6 = vcmp.gt.f32.partialorder %v391_v36, 0.0 }
 0x1f9   : > { %v394_v39 = vsel %vm392_vm6, %v391_v36, %v393_v38 }
 0x1fa   : > { %398 = vrot.lane.b32.xlu1 %v394_v39, %s818_s20  ;;  %395 = vrot.lane.b32.xlu0 %v394_v39, %s817_s12  ;;  %v405_v40 = vpack.c.bf16 %v394_v39, %v394_v39  ;;  %s627_s12 = sshll.u32 %s186_s11, 3 }
 0x1fb   : > { %s188_s14 = scalar_lea.vmem [#allocation2], %s627_s12 }
 0x1fc   : > { %v410_v41 = vsel %vm236_vm2, %v405_v40, 0  ;;  %s564_s20 = sshll.u32 %s188_s14, 4  ;;  %s975_s20 = int_to_ptr.vmem [resolvable:$true] %s564_s20 }
 0x1fd   : > { %679 = vmatpush3.bf16.msra.mxu1 %v410_v41  ;;  %s750_s28 = scalar_lea.vmem %s975_s20, 128  ;;  %p757_p0 = scmp.lt.s32.totalorder %s975_s20, %s755_s30 }
 0x1fe   : > { %684 = vmatprep.subr.bf16.mxu1 %v815_v4  ;;  %p751_p11 = scmp.ne.s32.totalorder %s975_s20, %s750_s28  ;;  %p758_p1 = scmp.lt.s32.totalorder %s756_s5, %s750_s28 }
 0x200   : > { %681 = vmatmul.mubr.msk.bf16.vlgmr.msra.gmra.mrb[0].mxu1 %vm232_vm3, %v639_v42  ;;  %p752_p12 = pnand %p751_p11, %p883_p5  ;;  %p759_p2 = por %p758_p1, %p757_p0 }
 0x201   : > { %686 = vmatprep.mubr.msk.bf16.mxu1 %vm816_vm0, %v815_v4 }
 0x202   : > { %p753_p13 = pneg %p752_p12 }
 0x204   : > { %p760_p3 = pnand %p759_p2, %p753_p13 }
 0x26c   : > { %v399_v43 = vpop.permute.xlu1 %398  ;;  %v396_v44 = vpop.permute.xlu0 %395 }
 0x26d   : > { %v400_v45 = vmul.f32 %v630_v21, %v399_v43  ;;  %v397_v46 = vmul.f32 %v629_v18, %v396_v44 }
 0x26f   : > { %v402_v47 = vpack.c.bf16 %v397_v46, %v397_v46  ;;  %v500_v48 = vpack.c.bf16 %v400_v45, %v400_v45 }
 0x271   : > { %v456_v49 = vsel %vm236_vm2, %v402_v47, 0  ;;  %v505_v51 = vsel %vm236_vm2, %v500_v48, 0 }
 0x272   : > { %685 = vmatpush3.bf16.msra.mxu1 %v456_v49 }
 0x273   : > { %690 = vmatprep.subr.bf16.mxu1 %v815_v4 }
 0x275   : > { %687 = vmatmul.mubr.msk.bf16.vlgmr.msra.gmra.mrb[4].mxu1 %vm232_vm3, %v401_v50 }
 0x276   : > { %691 = vmatpush3.bf16.msra.mxu1 %v505_v51  ;;  %692 = vmatprep.mubr.msk.bf16.mxu1 %vm816_vm0, %v815_v4 }
 0x27d   : > { %693 = vmatmul.mubr.msk.bf16.vlgmr.msra.gmra.mrb[8].mxu1 %vm232_vm3, %v642_v52 }
 0x2d3   : > { %v446_v53 = vpop.f32.mrb[0].mxu1 }
 0x2d4   : > { %v682_v54 = vpop.f32.mrb[1].mxu1 }
 0x2d5   : > { %v449_v55 = vpop.f32.mrb[2].mxu1 }
 0x2d6   : > { %v683_v56 = vpop.f32.mrb[3].mxu1 }
 0x348   : > { %v492_v57 = vpop.f32.mrb[4].mxu1 }
 0x349   : > { %v493_v58 = vadd.f32 %v492_v57, %v446_v53  ;;  %v688_v59 = vpop.f32.mrb[5].mxu1 }
 0x34a   : > { %v495_v60 = vpop.f32.mrb[6].mxu1 }
 0x34b   : > { %v689_v61 = vpop.f32.mrb[7].mxu1 }
 0x350   : > { %v541_v62 = vpop.f32.mrb[8].mxu1 }
 0x351   : > { %v547_v63 = vadd.f32 %v541_v62, %v493_v58  ;;  %v694_v0 = vpop.f32.mrb[9].mxu1 }
 0x352   : > { %v544_v1 = vpop.f32.mrb[10].mxu1 }
 0x353   : > { %v548_v2 = vadd.f32 %v547_v63, %v913_v6  ;;  %v695_v3 = vpop.f32.mrb[11].mxu1 }
 0x355   : > { %549 = vst [vmem:[%s188_s14] sm:$0xff] %v548_v2 }
 0x356   : > { %763 = shalt.err (!%p760_p3)
}
 0x357   : > { %s764_s6 = scalar_lea.hbm %s973_s27, 128  ;;  %s768_s9 = scalar_lea.hbm %s1019_s4, 256 }
 0x358   : > { %p765_p4 = scmp.ne.s32.totalorder %s973_s27, %s764_s6  ;;  %p769_p9 = scmp.lt.u32.totalorder %s973_s27, %s1019_s4 }
 0x359   : > { %p770_p10 = scmp.lt.u32.totalorder %s768_s9, %s764_s6  ;;  %p772_p12 = scmp.lt.u32.totalorder %s764_s6, %s973_s27 }
 0x35a   : > { %p766_p7 = pnand %p765_p4, %p883_p5 }
 0x35b   : > { %p771_p11 = por %p770_p10, %p769_p9 }
 0x35c   : > { %p767_p8 = pneg %p766_p7 }
 0x35d   : > { %p773_p13 = por %p772_p12, %p771_p11 }
 0x35f   : > { %p774_p0 = pnand %p773_p13, %p767_p8 }
 0x361   : > { %777 = shalt.err (!%p774_p0)
}
 0x362   : > { %704 = dma.vmem_to_hbm [thread:$0]  (%p883_p5), %s975_s20, 128, %s973_s27, %s551_s19  }
 0x363 PF: > { %p710_p1 = scmp.ge.s32.totalorder %s812_s18, 2  ;;  %s576_s12 = sand.u32 1, %s800_s15  }
 0x364   : > { %s577_s13 = scalar_lea.sflag [#allocation3], %s576_s12 }
 0x365   : > { %p707_p2 = pnand %p710_p1, %p887_p6 }
 0x367   : > { %795 = dma.done.wait (!%p707_p2), %s577_s13, 128  }
 0x368   : > { %797 = vsyncadd (!%p707_p2), %s577_s13, 4294967168  ;;  %p14_p3 = scmp.ge.s32.totalorder %s870_s21, 4   ;;  %s1022_s15 = smov %s804_s16 }
 0x369   : > { %s1023_s16 = smov %s808_s17  ;;  %s1024_s17 = smov %s881_s24 }
 0x36a   : > { %s1025_s18 = smov %s870_s21  ;;  %16 = sbr.rel (!%p14_p3) target bundleno = 3 (0x3), region = 78 }
 0x371   :  { %582 = vsyncpa [#allocation3], 1 }
 0x372   :  { %584 = vsyncpa [#allocation3 + $0x1], 1 }

</bundles_post_ra>
